<compile_context>
chip_gen: v5e
topology: v5e:2x2
jax: 0.10.0
libtpu: 0.0.40
codegen_flags: <defaults>
</compile_context>

<pallas_src>
import jax
import jax.numpy as jnp
from jax import lax
from jax.experimental import pallas as pl
from jax.experimental.pallas import tpu as pltpu


def _extrude_kernel(seg_ref, hf_ref, out_ref):
    # seg_ref, hf_ref: (tH, W, 1) blocks; out_ref: (tH, W, D) block.
    seg = seg_ref[...]                        # (tH, W, 1)
    hf = hf_ref[...].astype(jnp.int32)        # (tH, W, 1)

    D = out_ref.shape[-1]
    # Minimal-shape lane iota; broadcasting handles the rest.
    d_idx = lax.broadcasted_iota(jnp.int32, (1, 1, D), dimension=2)

    # volume[..., d] = seg where d <= height_field, else 0
    # (matches the reference / CUDA fill convention: height+1 voxels written)
    mask = d_idx <= hf                                            # (tH, W, D)
    vol = jnp.where(mask, seg, jnp.zeros((), seg.dtype))          # lane splat of seg
    out_ref[...] = vol.astype(out_ref.dtype)


def _pick_tile_h(H, W, D, itemsize, target_bytes=4 * 1024 * 1024):
    """Largest divisor of H whose output block (tH, W, D) stays <= target_bytes."""
    max_rows = max(1, target_bytes // max(1, W * D * itemsize))
    best = 1
    for t in range(1, H + 1):
        if H % t == 0 and t <= max_rows:
            best = t
    return best


def tensor_extruder(seg_map, height_field, max_height=256, *, out_dtype=None,
                    validate=False):
    """Pallas equivalent of TensorExtruder(max_height)(seg_map, height_field)."""
    assert seg_map.ndim == 4, "expected NCHW seg_map"
    assert height_field.shape == seg_map.shape, "seg_map / height_field shape mismatch"

    if validate:
        # Eager-only debug check (forces a host sync; do not use under jit).
        hf_max = int(jnp.max(height_field))
        assert hf_max < max_height, "Max Value %d" % hf_max

    N, C, H, W = seg_map.shape
    D = max_height
    out_dtype = seg_map.dtype if out_dtype is None else out_dtype
    itemsize = jnp.dtype(out_dtype).itemsize

    # Output-block tiling over H: keep each (tH, W, D) block ~<= 4 MiB.
    tH = _pick_tile_h(H, W, D, itemsize)
    nH = H // tH

    # Trailing singleton depth dim so the in-kernel broadcast over D is a lane
    # splat (W on sublanes, D on lanes) with no relayout.
    seg5 = seg_map.reshape(N, C, H, W, 1)
    hf5 = height_field.reshape(N, C, H, W, 1)

    out_shape = jax.ShapeDtypeStruct((N, C, H, W, D), out_dtype)

    in_spec = pl.BlockSpec((None, None, tH, W, 1), lambda n, c, h: (n, c, h, 0, 0))
    out_spec = pl.BlockSpec((None, None, tH, W, D), lambda n, c, h: (n, c, h, 0, 0))

    return pl.pallas_call(
        _extrude_kernel,
        out_shape=out_shape,
        grid_spec=pltpu.PrefetchScalarGridSpec(
            num_scalar_prefetch=0,
            grid=(N, C, nH),
            in_specs=[in_spec, in_spec],
            out_specs=out_spec,
        ),
        compiler_params=pltpu.CompilerParams(
            dimension_semantics=("parallel", "parallel", "parallel")
        ),
    )(seg5, hf5)


if __name__ == "__main__":
    # Small, deterministic inputs consistent with the module's forward:
    # batch=2, channels=1, spatial 16x16, max_height=256 (module default).
    key = jax.random.PRNGKey(0)
    k_seg, k_hf = jax.random.split(key)

    N, C, H, W = 2, 1, 16, 16
    MAX_HEIGHT = 256

    seg_map = jax.random.randint(k_seg, (N, C, H, W), 0, 10, dtype=jnp.int32)
    height_field = jax.random.randint(
        k_hf, (N, C, H, W), 0, MAX_HEIGHT, dtype=jnp.int32
    )

    volume = tensor_extruder(seg_map, height_field, max_height=MAX_HEIGHT)
    volume = jax.block_until_ready(volume)

    # Reference check in plain JAX (same broadcasting semantics as the CUDA op).
    d = jnp.arange(MAX_HEIGHT, dtype=jnp.int32)
    ref = jnp.where(
        d[None, None, None, None, :] <= height_field[..., None],
        seg_map[..., None],
        0,
    ).astype(seg_map.dtype)

    assert volume.shape == (N, C, H, W, MAX_HEIGHT)
    assert volume.dtype == seg_map.dtype
    assert bool(jnp.all(volume == ref))

    print("KERNEL_OK")
</pallas_src>

<mosaic_0001>
module attributes {stable_mosaic.version = 11 : i64} {
  func.func @_extrude_kernel(%arg0: i32, %arg1: i32, %arg2: i32, %arg3: memref<1x1x16x16x1xi32, #tpu.memory_space<vmem>>, %arg4: memref<1x1x16x16x1xi32, #tpu.memory_space<vmem>>, %arg5: memref<1x1x16x16x256xi32, #tpu.memory_space<vmem>>) attributes {dimension_semantics = [#tpu.dimension_semantics<parallel>, #tpu.dimension_semantics<parallel>, #tpu.dimension_semantics<parallel>], iteration_bounds = array<i64: 2, 1, 1>, scalar_prefetch = 0 : i64, scratch_operands = 0 : i64, tpu.core_type = #tpu.core_type<tc>, window_params = [{transform_indices = @transform_0, window_bounds = array<i64: 1, 1, 16, 16, 1>}, {transform_indices = @transform_1, window_bounds = array<i64: 1, 1, 16, 16, 1>}, {transform_indices = @transform_2, window_bounds = array<i64: 1, 1, 16, 16, 256>}]} {
    %c0 = arith.constant 0 : index
    %c0_0 = arith.constant 0 : index
    %c0_1 = arith.constant 0 : index
    %c0_2 = arith.constant 0 : index
    %c0_3 = arith.constant 0 : index
    %0 = vector.load %arg3[%c0, %c0_0, %c0_1, %c0_2, %c0_3] : memref<1x1x16x16x1xi32, #tpu.memory_space<vmem>>, vector<1x1x16x16x1xi32>
    %1 = vector.shape_cast %0 : vector<1x1x16x16x1xi32> to vector<16x16x1xi32>
    %c0_4 = arith.constant 0 : index
    %c0_5 = arith.constant 0 : index
    %c0_6 = arith.constant 0 : index
    %c0_7 = arith.constant 0 : index
    %c0_8 = arith.constant 0 : index
    %2 = vector.load %arg4[%c0_4, %c0_5, %c0_6, %c0_7, %c0_8] : memref<1x1x16x16x1xi32, #tpu.memory_space<vmem>>, vector<1x1x16x16x1xi32>
    %3 = vector.shape_cast %2 : vector<1x1x16x16x1xi32> to vector<16x16x1xi32>
    %4 = tpu.iota {dimensions = array<i32: 2>} : vector<1x1x256xi32>
    %5 = vector.broadcast %4 : vector<1x1x256xi32> to vector<16x16x256xi32>
    %6 = vector.broadcast %3 : vector<16x16x1xi32> to vector<16x16x256xi32>
    %7 = arith.cmpi sle, %5, %6 : vector<16x16x256xi32>
    %c0_i32 = arith.constant 0 : i32
    %8 = vector.shape_cast %1 : vector<16x16x1xi32> to vector<16x16x1xi32>
    %9 = vector.broadcast %8 : vector<16x16x1xi32> to vector<16x16x256xi32>
    %10 = vector.broadcast %c0_i32 : i32 to vector<16x16x256xi32>
    %11 = arith.select %7, %9, %10 : vector<16x16x256xi1>, vector<16x16x256xi32>
    %c0_9 = arith.constant 0 : index
    %c0_10 = arith.constant 0 : index
    %c0_11 = arith.constant 0 : index
    %c0_12 = arith.constant 0 : index
    %c0_13 = arith.constant 0 : index
    %12 = vector.load %arg5[%c0_9, %c0_10, %c0_11, %c0_12, %c0_13] : memref<1x1x16x16x256xi32, #tpu.memory_space<vmem>>, vector<1x1x16x16x256xi32>
    %13 = vector.shape_cast %12 : vector<1x1x16x16x256xi32> to vector<16x16x256xi32>
    %14 = vector.shape_cast %11 : vector<16x16x256xi32> to vector<1x1x16x16x256xi32>
    tpu.vector_store %arg5[%c0_9, %c0_10, %c0_11, %c0_12, %c0_13], %14 {strides = array<i32>} : memref<1x1x16x16x256xi32, #tpu.memory_space<vmem>>, vector<1x1x16x16x256xi32>,
    return
  }
  func.func @transform_0(%arg0: i32, %arg1: i32, %arg2: i32) -> (i32, i32, i32, i32, i32) {
    %c0_i32 = arith.constant 0 : i32
    %c0_i32_0 = arith.constant 0 : i32
    %c0_i32_1 = arith.constant 0 : i32
    return %arg0, %arg1, %arg2, %c0_i32, %c0_i32_0 : i32, i32, i32, i32, i32
  }
  func.func @transform_1(%arg0: i32, %arg1: i32, %arg2: i32) -> (i32, i32, i32, i32, i32) {
    %c0_i32 = arith.constant 0 : i32
    %c0_i32_0 = arith.constant 0 : i32
    %c0_i32_1 = arith.constant 0 : i32
    return %arg0, %arg1, %arg2, %c0_i32, %c0_i32_0 : i32, i32, i32, i32, i32
  }
  func.func @transform_2(%arg0: i32, %arg1: i32, %arg2: i32) -> (i32, i32, i32, i32, i32) {
    %c0_i32 = arith.constant 0 : i32
    %c0_i32_0 = arith.constant 0 : i32
    %c0_i32_1 = arith.constant 0 : i32
    return %arg0, %arg1, %arg2, %c0_i32, %c0_i32_0 : i32, i32, i32, i32, i32
  }
}

</mosaic_0001>

<bundles_post_ra>
// kernel: tpu_custom_call.1
= control target key start
LH: loop header
LB: loop body
LE: loop exit
PB: predicated region body
PF: predicated region fallthrough
CT: control target
= control target key end

     0   :  { %7 = vsyncpa [#allocation3], 0  ;;  %s1464_s0 = inlined_call_operand.vmem [shape: s32[2,1,16,16,1], index: 0, kind: input, shape index: {}]   ;;  %s1465_s1 = inlined_call_operand.vmem [shape: s32[2,1,16,16,1], index: 1, kind: input, shape index: {}]   ;;  %s1466_s2 = inlined_call_operand.hbm [shape: s32[2,1,16,16,256], index: 2, kind: output, shape index: {}]  }
   0x1   :  { %9 = vsyncpa [#allocation3 + $0x1], 0  ;;  %s1021_s9 = smov 0   ;;  %s1023_s10 = smov 0  }
   0x2   :  { %s1025_s11 = smov 0   ;;  %s1027_s12 = smov 0  }
   0x3   :  { %s1029_s13 = smov 0   ;;  %s1031_s14 = smov 0  }
   0x4 LB: > { %s844_s15 = sadd.s32 4294967295, %s1001_s14   ;;  %s845_s16 = sadd.s32 4294967294, %s1001_s14   ;;  %s1001_s14 = sphi %s1031_s14, %s15_s14   ;;  %s997_s13 = sphi %s1029_s13, %s1473_s13   ;;  %s993_s12 = sphi %s1027_s12, %s1472_s12   ;;  %s989_s11 = sphi %s1025_s11, %s1471_s11   ;;  %s985_s10 = sphi %s1023_s10, %s1470_s10   ;;  %s981_s9 = sphi %s1021_s9, %s1469_s9  }
   0x5   : > { %s34_s17 = sadd.s32 1, %s997_s13  ;;  %s105_s18 = sadd.s32 1, %s989_s11 }
   0x6   : > { %p36_p0 = scmp.ge.s32.totalorder %s34_s17, 2  ;;  %p115_p1 = scmp.ne.s32.totalorder %s989_s11, %s985_s10 }
   0x7   : > { %p116_p2 = scmp.eq.s32.totalorder %s844_s15, 1  ;;  %p121_p3 = scmp.ne.s32.totalorder %s985_s10, %s981_s9 }
   0x8   : > { %s1475_s17 = smov (%p36_p0, %s34_s17), 0  ;;  %p122_p5 = scmp.eq.s32.totalorder %s845_s16, 1 }
   0x9   : > { %p1061_p4 = por %p116_p2, %p115_p1  ;;  %s98_s20 = ssub.s32 %s997_s13, %s1475_s17 }
   0xa   : > { %p848_p6 = scmp.ge.s32.totalorder %s1001_s14, 1  ;;  %p103_p7 = scmp.eq.s32.totalorder %s98_s20, 0 }
   0xb   : > { %p1068_p8 = por %p122_p5, %p121_p3  ;;  %p176_p9 = scmp.lt.s32.totalorder %s1001_s14, 3 }
   0xc   : > { %s1074_s22 = scalar_select %p103_p7, %s989_s11, %s105_s18  }
   0xd   : > { %p177_p10 = pnand %p848_p6, %p176_p9 }
   0xe   : > { %p222_p11 = scmp.lt.s32.totalorder (!%p177_p10), %s993_s12, 1  ;;  %s218_s3 = sand.u32 (!%p177_p10), 1, %s985_s10  }
   0xf   : > { %180 = sbr.rel (%p177_p10) target bundleno = 315 (0x13b), region = 28  ;;  %s849_s4 = sshll.u32 (!%p177_p10), %s218_s3, 9 }
  0x10   : > { %s1223_s5 = scalar_lea.vmem (!%p177_p10), [#allocation2], %s849_s4  ;;  %s861_s6 = sshll.u32 (!%p177_p10), %s993_s12, 9 }
  0x11   : > { %s721_s15 = sshll.u32 (!%p177_p10), %s1223_s5, 4  ;;  %s704_s18 = scalar_lea.sflag (!%p177_p10), [#allocation3], %s218_s3  ;;  %s722_s15 = int_to_ptr.vmem [resolvable:$true] %s721_s15 }
  0x12   : > { %s943_s26 = scalar_lea.hbm (!%p177_p10), %s1466_s2, 1024 }
  0x14   : > { %v1003_v0 = vmov 0   ;;  %s1078_s23 = scalar_select %p222_p11, %s993_s12, 1 }
  0x15   : > { %922 = vset.pattern.permute.xlu2 %v1003_v0  ;;  %921 = vset.pattern.permute.xlu1 %v1003_v0  ;;  %s720_s12 = scalar_lea.hbm %s1466_s2, %s861_s6 }
  0x16   : > { %920 = vset.pattern.permute.xlu0 %v1003_v0  ;;  %s859_s24 = sshll.u32 %s1078_s23, 8  ;;  %s723_s16 = sshll.u32 %s720_s12, 4  ;;  %s724_s16 = int_to_ptr.hbm [resolvable:$true] %s723_s16 }
  0x17   : > { %s1086_s27 = scalar_lea.vmem %s1465_s1, %s859_s24  ;;  %s1123_s30 = scalar_lea.vmem %s1464_s0, %s859_s24 }
  0x18   : > { %v288_v1 = vld [vmem:[%s1086_s27 + $0x20] sm:$0xff]  ;;  %v286_v2 = vld [vmem:[%s1086_s27 + $0x10] sm:$0xff]  ;;  %v289_v4 = vld [vmem:[%s1086_s27 + $0x28] sm:$0xff]  ;;  %s937_s20 = sshra.s32 %s724_s16, 4  ;;  %s938_s20 = int_to_ptr.hbm [resolvable:$true] %s937_s20 }
  0x19   : > { %v284_v3 = vld [vmem:[%s1086_s27] sm:$0xff]  ;;  %332 = vperm.xlu2 %922, %v288_v1   ;;  %326 = vperm.xlu1 %921, %v286_v2   ;;  %v287_v5 = vld [vmem:[%s1086_s27 + $0x18] sm:$0xff]  ;;  %v285_v6 = vld [vmem:[%s1086_s27 + $0x8] sm:$0xff]  ;;  %s939_s23 = scalar_lea.hbm %s938_s20, 512  ;;  %p944_p1 = scmp.lt.s32.totalorder %s938_s20, %s1466_s2 }
  0x1a   : > { %320 = vperm.xlu0 %920, %v284_v3   ;;  %v292_v7 = vld [vmem:[%s1086_s27 + $0x40] sm:$0xff]  ;;  %v291_v8 = vld [vmem:[%s1086_s27 + $0x38] sm:$0xff]  ;;  %v290_v9 = vld [vmem:[%s1086_s27 + $0x30] sm:$0xff]  ;;  %p940_p12 = scmp.ne.s32.totalorder %s938_s20, %s939_s23  ;;  %p945_p2 = scmp.lt.s32.totalorder %s943_s26, %s939_s23 }
  0x1b   : > { %v295_v10 = vld [vmem:[%s1086_s27 + $0x58] sm:$0xff]  ;;  %v294_v11 = vld [vmem:[%s1086_s27 + $0x50] sm:$0xff]  ;;  %v293_v12 = vld [vmem:[%s1086_s27 + $0x48] sm:$0xff] }
  0x1c   : > { %v298_v13 = vld [vmem:[%s1086_s27 + $0x70] sm:$0xff]  ;;  %v297_v14 = vld [vmem:[%s1086_s27 + $0x68] sm:$0xff]  ;;  %v296_v15 = vld [vmem:[%s1086_s27 + $0x60] sm:$0xff]  ;;  %p941_p13 = pnand %p940_p12, %p1061_p4  ;;  %p946_p3 = por %p945_p2, %p944_p1 }
  0x1d   : > { %v301_v16 = vld [vmem:[%s1086_s27 + $0x88] sm:$0xff]  ;;  %v300_v17 = vld [vmem:[%s1086_s27 + $0x80] sm:$0xff]  ;;  %v299_v18 = vld [vmem:[%s1086_s27 + $0x78] sm:$0xff] }
  0x1e   : > { %v304_v19 = vld [vmem:[%s1086_s27 + $0xa0] sm:$0xff]  ;;  %v303_v20 = vld [vmem:[%s1086_s27 + $0x98] sm:$0xff]  ;;  %v302_v21 = vld [vmem:[%s1086_s27 + $0x90] sm:$0xff]  ;;  %p942_p0 = pneg %p941_p13 }
  0x1f   : > { %v307_v22 = vld [vmem:[%s1086_s27 + $0xb8] sm:$0xff]  ;;  %v306_v23 = vld [vmem:[%s1086_s27 + $0xb0] sm:$0xff]  ;;  %v305_v24 = vld [vmem:[%s1086_s27 + $0xa8] sm:$0xff] }
  0x20   : > { %v310_v25 = vld [vmem:[%s1086_s27 + $0xd0] sm:$0xff]  ;;  %v309_v26 = vld [vmem:[%s1086_s27 + $0xc8] sm:$0xff]  ;;  %v308_v27 = vld [vmem:[%s1086_s27 + $0xc0] sm:$0xff]  ;;  %p947_p5 = pnand %p946_p3, %p942_p0 }
  0x21   : > { %335 = vperm.xlu2 %922, %v289_v4   ;;  %329 = vperm.xlu1 %921, %v287_v5   ;;  %v313_v28 = vld [vmem:[%s1086_s27 + $0xe8] sm:$0xff]  ;;  %v312_v29 = vld [vmem:[%s1086_s27 + $0xe0] sm:$0xff]  ;;  %v311_v30 = vld [vmem:[%s1086_s27 + $0xd8] sm:$0xff] }
  0x22   : > { %323 = vperm.xlu0 %920, %v285_v6   ;;  %v315_v31 = vld [vmem:[%s1086_s27 + $0xf8] sm:$0xff]  ;;  %v252_v32 = vld [vmem:[%s1123_s30] sm:$0xff]  ;;  %v314_v33 = vld [vmem:[%s1086_s27 + $0xf0] sm:$0xff] }
  0x23   : > { %v254_v34 = vld [vmem:[%s1123_s30 + $0x10] sm:$0xff]  ;;  %v255_v35 = vld [vmem:[%s1123_s30 + $0x18] sm:$0xff]  ;;  %v253_v36 = vld [vmem:[%s1123_s30 + $0x8] sm:$0xff] }
  0x24   : > { %v257_v38 = vld [vmem:[%s1123_s30 + $0x28] sm:$0xff]  ;;  %v258_v39 = vld [vmem:[%s1123_s30 + $0x30] sm:$0xff]  ;;  %v256_v40 = vld [vmem:[%s1123_s30 + $0x20] sm:$0xff] }
  0x25   : > { %v260_v42 = vld [vmem:[%s1123_s30 + $0x40] sm:$0xff]  ;;  %v261_v43 = vld [vmem:[%s1123_s30 + $0x48] sm:$0xff]  ;;  %v259_v44 = vld [vmem:[%s1123_s30 + $0x38] sm:$0xff] }
  0x26   : > { %v263_v46 = vld [vmem:[%s1123_s30 + $0x58] sm:$0xff]  ;;  %v264_v47 = vld [vmem:[%s1123_s30 + $0x60] sm:$0xff]  ;;  %v262_v48 = vld [vmem:[%s1123_s30 + $0x50] sm:$0xff] }
  0x27   : > { %v266_v52 = vld [vmem:[%s1123_s30 + $0x70] sm:$0xff]  ;;  %v267_v53 = vld [vmem:[%s1123_s30 + $0x78] sm:$0xff]  ;;  %v265_v54 = vld [vmem:[%s1123_s30 + $0x68] sm:$0xff] }
  0x28   : > { %v269_v58 = vld [vmem:[%s1123_s30 + $0x88] sm:$0xff]  ;;  %v270_v59 = vld [vmem:[%s1123_s30 + $0x90] sm:$0xff]  ;;  %v268_v60 = vld [vmem:[%s1123_s30 + $0x80] sm:$0xff] }
  0x29   : > { %344 = vperm.xlu2 %922, %v292_v7   ;;  %341 = vperm.xlu1 %921, %v291_v8   ;;  %v272_v0 = vld [vmem:[%s1123_s30 + $0xa0] sm:$0xff]  ;;  %v273_v1 = vld [vmem:[%s1123_s30 + $0xa8] sm:$0xff]  ;;  %v271_v2 = vld [vmem:[%s1123_s30 + $0x98] sm:$0xff] }
  0x2a   : > { %338 = vperm.xlu0 %920, %v290_v9   ;;  %v275_v6 = vld [vmem:[%s1123_s30 + $0xb8] sm:$0xff]  ;;  %v276_v7 = vld [vmem:[%s1123_s30 + $0xc0] sm:$0xff]  ;;  %v274_v8 = vld [vmem:[%s1123_s30 + $0xb0] sm:$0xff] }
  0x31   : > { %353 = vperm.xlu2 %922, %v295_v10   ;;  %350 = vperm.xlu1 %921, %v294_v11  }
  0x32   : > { %347 = vperm.xlu0 %920, %v293_v12   ;;  %v278_v12 = vld [vmem:[%s1123_s30 + $0xd0] sm:$0xff] }
  0x39   : > { %362 = vperm.xlu2 %922, %v298_v13   ;;  %359 = vperm.xlu1 %921, %v297_v14   ;;  %v279_v13 = vld [vmem:[%s1123_s30 + $0xd8] sm:$0xff]  ;;  %v277_v14 = vld [vmem:[%s1123_s30 + $0xc8] sm:$0xff] }
  0x3a   : > { %356 = vperm.xlu0 %920, %v296_v15  }
  0x41   : > { %371 = vperm.xlu2 %922, %v301_v16   ;;  %368 = vperm.xlu1 %921, %v300_v17  }
  0x42   : > { %365 = vperm.xlu0 %920, %v299_v18   ;;  %v281_v18 = vld [vmem:[%s1123_s30 + $0xe8] sm:$0xff] }
  0x49   : > { %380 = vperm.xlu2 %922, %v304_v19   ;;  %377 = vperm.xlu1 %921, %v303_v20   ;;  %v282_v19 = vld [vmem:[%s1123_s30 + $0xf0] sm:$0xff]  ;;  %v316_v20 = vlaneseq }
  0x4a   : > { %374 = vperm.xlu0 %920, %v302_v21   ;;  %v280_v21 = vld [vmem:[%s1123_s30 + $0xe0] sm:$0xff] }
  0x51   : > { %389 = vperm.xlu2 %922, %v307_v22   ;;  %386 = vperm.xlu1 %921, %v306_v23   ;;  %v1200_v22 = vand.u32 127, %v316_v20 }
  0x52   : > { %383 = vperm.xlu0 %920, %v305_v24  }
  0x59   : > { %398 = vperm.xlu2 %922, %v310_v25   ;;  %395 = vperm.xlu1 %921, %v309_v26   ;;  %v1210_v26 = vadd.s32 128, %v1200_v22 }
  0x5a   : > { %392 = vperm.xlu0 %920, %v308_v27   ;;  %v283_v27 = vld [vmem:[%s1123_s30 + $0xf8] sm:$0xff] }
  0x61   : > { %407 = vperm.xlu2 %922, %v313_v28   ;;  %404 = vperm.xlu1 %921, %v312_v29  }
  0x62   : > { %401 = vperm.xlu0 %920, %v311_v30  }
  0x69   : > { %413 = vperm.xlu1 %921, %v315_v31   ;;  %480 = vperm.xlu2 %922, %v252_v32  }
  0x6a   : > { %410 = vperm.xlu0 %920, %v314_v33  }
  0x71   : > { %486 = vperm.xlu1 %921, %v254_v34   ;;  %489 = vperm.xlu2 %922, %v255_v35  }
  0x72   : > { %483 = vperm.xlu0 %920, %v253_v36  }
  0x73   : > { %v1131_v37 = vpop.permute.xlu2 %332 }
  0x79   : > { %495 = vperm.xlu1 %921, %v257_v38   ;;  %498 = vperm.xlu2 %922, %v258_v39  }
  0x7a   : > { %492 = vperm.xlu0 %920, %v256_v40  }
  0x7b   : > { %v1136_v41 = vpop.permute.xlu2 %335 }
  0x7c   : > { %vm425_vm14 = vcmp.le.s32.totalorder %v1200_v22, %v1136_v41  ;;  %vm426_vm15 = vcmp.le.s32.totalorder %v1210_v26, %v1136_v41 }
  0x81   : > { %504 = vperm.xlu1 %921, %v260_v42   ;;  %507 = vperm.xlu2 %922, %v261_v43  }
  0x82   : > { %501 = vperm.xlu0 %920, %v259_v44  }
  0x83   : > { %v1141_v45 = vpop.permute.xlu2 %344 }
  0x89   : > { %513 = vperm.xlu1 %921, %v263_v46   ;;  %516 = vperm.xlu2 %922, %v264_v47  }
  0x8a   : > { %510 = vperm.xlu0 %920, %v262_v48  }
  0x8b   : > { %v1146_v49 = vpop.permute.xlu2 %353  ;;  %v1148_v50 = vpop.permute.xlu1 %326 }
  0x8c   : > { %v1150_v51 = vpop.permute.xlu0 %320  ;;  %vm419_vm8 = vcmp.le.s32.totalorder %v1200_v22, %v1148_v50  ;;  %vm420_vm9 = vcmp.le.s32.totalorder %v1210_v26, %v1148_v50 }
  0x8d   : > { %vm415_vm0 = vcmp.le.s32.totalorder %v1200_v22, %v1150_v51  ;;  %vm416_vm1 = vcmp.le.s32.totalorder %v1210_v26, %v1150_v51 }
  0x91   : > { %522 = vperm.xlu1 %921, %v266_v52   ;;  %525 = vperm.xlu2 %922, %v267_v53  }
  0x92   : > { %519 = vperm.xlu0 %920, %v265_v54  }
  0x93   : > { %v1155_v55 = vpop.permute.xlu2 %362  ;;  %v1157_v56 = vpop.permute.xlu1 %329 }
  0x94   : > { %v1159_v57 = vpop.permute.xlu0 %323  ;;  %vm421_vm2 = vcmp.le.s32.totalorder %v1200_v22, %v1157_v56  ;;  %vm422_vm3 = vcmp.le.s32.totalorder %v1210_v26, %v1157_v56 }
  0x95   : > { %vm417_vm10 = vcmp.le.s32.totalorder %v1200_v22, %v1159_v57  ;;  %vm418_vm11 = vcmp.le.s32.totalorder %v1210_v26, %v1159_v57 }
  0x99   : > { %531 = vperm.xlu1 %921, %v269_v58   ;;  %534 = vperm.xlu2 %922, %v270_v59  }
  0x9a   : > { %528 = vperm.xlu0 %920, %v268_v60  }
  0x9b   : > { %v1164_v61 = vpop.permute.xlu2 %371  ;;  %v1166_v62 = vpop.permute.xlu1 %341 }
  0x9c   : > { %v1168_v63 = vpop.permute.xlu0 %338 }
  0x9d   : > { %vm427_vm4 = vcmp.le.s32.totalorder %v1200_v22, %v1168_v63  ;;  %vm428_vm5 = vcmp.le.s32.totalorder %v1210_v26, %v1168_v63 }
  0xa1   : > { %540 = vperm.xlu1 %921, %v272_v0   ;;  %543 = vperm.xlu2 %922, %v273_v1  }
  0xa2   : > { %537 = vperm.xlu0 %920, %v271_v2  }
  0xa3   : > { %v1173_v3 = vpop.permute.xlu2 %380  ;;  %v1175_v4 = vpop.permute.xlu1 %350 }
  0xa4   : > { %v1177_v5 = vpop.permute.xlu0 %347 }
  0xa5   : > { %vm433_vm6 = vcmp.le.s32.totalorder %v1200_v22, %v1177_v5  ;;  %vm434_vm7 = vcmp.le.s32.totalorder %v1210_v26, %v1177_v5 }
  0xa9   : > { %549 = vperm.xlu1 %921, %v275_v6   ;;  %552 = vperm.xlu2 %922, %v276_v7  }
  0xaa   : > { %546 = vperm.xlu0 %920, %v274_v8  }
  0xab   : > { %v1182_v9 = vpop.permute.xlu2 %389  ;;  %v1184_v10 = vpop.permute.xlu1 %359 }
  0xac   : > { %v1186_v11 = vpop.permute.xlu0 %356 }
  0xad   : > { %vm439_vm12 = vcmp.le.s32.totalorder %v1200_v22, %v1186_v11  ;;  %vm440_vm13 = vcmp.le.s32.totalorder %v1210_v26, %v1186_v11 }
  0xb1   : > { %558 = vperm.xlu1 %921, %v278_v12   ;;  %561 = vperm.xlu2 %922, %v279_v13  }
  0xb2   : > { %555 = vperm.xlu0 %920, %v277_v14  }
  0xb3   : > { %v1191_v15 = vpop.permute.xlu2 %398  ;;  %v1193_v16 = vpop.permute.xlu1 %368 }
  0xb4   : > { %v1195_v17 = vpop.permute.xlu0 %365 }
  0xb9   : > { %567 = vperm.xlu1 %921, %v281_v18   ;;  %570 = vperm.xlu2 %922, %v282_v19  }
  0xba   : > { %564 = vperm.xlu0 %920, %v280_v21  }
  0xbb   : > { %v1202_v23 = vpop.permute.xlu2 %407  ;;  %v1204_v24 = vpop.permute.xlu1 %377 }
  0xbc   : > { %v1206_v25 = vpop.permute.xlu0 %374 }
  0xc2   : > { %573 = vperm.xlu0 %920, %v283_v27  }
  0xc3   : > { %v1219_v28 = vpop.permute.xlu1 %386  ;;  %v481_v29 = vpop.permute.xlu2 %480 }
  0xc4   : > { %v1221_v30 = vpop.permute.xlu0 %383  ;;  %v575_v31 = vsel %vm415_vm0, %v481_v29, 0  ;;  %v576_v32 = vsel %vm416_vm1, %v481_v29, 0  ;;  %vm423_vm0 = vcmp.le.s32.totalorder %v1200_v22, %v1131_v37  ;;  %vm424_vm1 = vcmp.le.s32.totalorder %v1210_v26, %v1131_v37 }
  0xc5   : > { %639 = vst [vmem:[%s1223_s5] sm:$0xff] %v575_v31 }
  0xc6   : > { %640 = vst [vmem:[%s1223_s5 + $0x8] sm:$0xff] %v576_v32 }
  0xcb   : > { %v1231_v33 = vpop.permute.xlu1 %395  ;;  %v490_v34 = vpop.permute.xlu2 %489 }
  0xcc   : > { %v1233_v35 = vpop.permute.xlu0 %392  ;;  %v581_v36 = vsel %vm421_vm2, %v490_v34, 0  ;;  %v582_v38 = vsel %vm422_vm3, %v490_v34, 0  ;;  %vm445_vm2 = vcmp.le.s32.totalorder %v1200_v22, %v1195_v17  ;;  %vm446_vm3 = vcmp.le.s32.totalorder %v1210_v26, %v1195_v17 }
  0xcd   : > { %645 = vst [vmem:[%s1223_s5 + $0x30] sm:$0xff] %v581_v36 }
  0xce   : > { %646 = vst [vmem:[%s1223_s5 + $0x38] sm:$0xff] %v582_v38 }
  0xd3   : > { %v1241_v39 = vpop.permute.xlu1 %404  ;;  %v499_v40 = vpop.permute.xlu2 %498 }
  0xd4   : > { %v1243_v42 = vpop.permute.xlu0 %401  ;;  %v587_v43 = vsel %vm427_vm4, %v499_v40, 0  ;;  %v588_v44 = vsel %vm428_vm5, %v499_v40, 0  ;;  %vm431_vm4 = vcmp.le.s32.totalorder %v1200_v22, %v1141_v45  ;;  %vm432_vm5 = vcmp.le.s32.totalorder %v1210_v26, %v1141_v45 }
  0xd5   : > { %651 = vst [vmem:[%s1223_s5 + $0x60] sm:$0xff] %v587_v43 }
  0xd6   : > { %652 = vst [vmem:[%s1223_s5 + $0x68] sm:$0xff] %v588_v44 }
  0xdb   : > { %v1251_v46 = vpop.permute.xlu1 %413  ;;  %v508_v47 = vpop.permute.xlu2 %507 }
  0xdc   : > { %v1253_v48 = vpop.permute.xlu0 %410  ;;  %v593_v51 = vsel %vm433_vm6, %v508_v47, 0  ;;  %v594_v52 = vsel %vm434_vm7, %v508_v47, 0  ;;  %vm429_vm6 = vcmp.le.s32.totalorder %v1200_v22, %v1166_v62  ;;  %vm430_vm7 = vcmp.le.s32.totalorder %v1210_v26, %v1166_v62 }
  0xdd   : > { %657 = vst [vmem:[%s1223_s5 + $0x90] sm:$0xff] %v593_v51 }
  0xde   : > { %658 = vst [vmem:[%s1223_s5 + $0x98] sm:$0xff] %v594_v52 }
  0xe3   : > { %v487_v53 = vpop.permute.xlu1 %486  ;;  %v517_v54 = vpop.permute.xlu2 %516 }
  0xe4   : > { %v579_v56 = vsel %vm419_vm8, %v487_v53, 0  ;;  %v580_v58 = vsel %vm420_vm9, %v487_v53, 0  ;;  %v484_v59 = vpop.permute.xlu0 %483  ;;  %v599_v63 = vsel %vm439_vm12, %v517_v54, 0  ;;  %v600_v0 = vsel %vm440_vm13, %v517_v54, 0 }
  0xe5   : > { %643 = vst [vmem:[%s1223_s5 + $0x20] sm:$0xff] %v579_v56  ;;  %v577_v60 = vsel %vm417_vm10, %v484_v59, 0  ;;  %v578_v50 = vsel %vm418_vm11, %v484_v59, 0  ;;  %vm451_vm8 = vcmp.le.s32.totalorder %v1200_v22, %v1206_v25  ;;  %vm452_vm9 = vcmp.le.s32.totalorder %v1210_v26, %v1206_v25 }
  0xe6   : > { %644 = vst [vmem:[%s1223_s5 + $0x28] sm:$0xff] %v580_v58  ;;  %vm437_vm10 = vcmp.le.s32.totalorder %v1200_v22, %v1146_v49  ;;  %vm438_vm11 = vcmp.le.s32.totalorder %v1210_v26, %v1146_v49  ;;  %vm435_vm12 = vcmp.le.s32.totalorder %v1200_v22, %v1175_v4  ;;  %vm436_vm13 = vcmp.le.s32.totalorder %v1210_v26, %v1175_v4 }
  0xe7   : > { %641 = vst [vmem:[%s1223_s5 + $0x10] sm:$0xff] %v577_v60 }
  0xe8   : > { %642 = vst [vmem:[%s1223_s5 + $0x18] sm:$0xff] %v578_v50 }
  0xe9   : > { %663 = vst [vmem:[%s1223_s5 + $0xc0] sm:$0xff] %v599_v63 }
  0xea   : > { %664 = vst [vmem:[%s1223_s5 + $0xc8] sm:$0xff] %v600_v0 }
  0xeb   : > { %v496_v57 = vpop.permute.xlu1 %495  ;;  %v526_v1 = vpop.permute.xlu2 %525 }
  0xec   : > { %v585_v2 = vsel %vm425_vm14, %v496_v57, 0  ;;  %v586_v5 = vsel %vm426_vm15, %v496_v57, 0  ;;  %v493_v6 = vpop.permute.xlu0 %492  ;;  %v605_v8 = vsel %vm445_vm2, %v526_v1, 0  ;;  %v606_v11 = vsel %vm446_vm3, %v526_v1, 0 }
  0xed   : > { %649 = vst [vmem:[%s1223_s5 + $0x50] sm:$0xff] %v585_v2  ;;  %v583_v7 = vsel %vm423_vm0, %v493_v6, 0  ;;  %v584_v41 = vsel %vm424_vm1, %v493_v6, 0  ;;  %vm457_vm14 = vcmp.le.s32.totalorder %v1200_v22, %v1221_v30  ;;  %vm458_vm15 = vcmp.le.s32.totalorder %v1210_v26, %v1221_v30 }
  0xee   : > { %650 = vst [vmem:[%s1223_s5 + $0x58] sm:$0xff] %v586_v5  ;;  %vm443_vm0 = vcmp.le.s32.totalorder %v1200_v22, %v1155_v55  ;;  %vm444_vm1 = vcmp.le.s32.totalorder %v1210_v26, %v1155_v55  ;;  %vm441_vm2 = vcmp.le.s32.totalorder %v1200_v22, %v1184_v10  ;;  %vm442_vm3 = vcmp.le.s32.totalorder %v1210_v26, %v1184_v10 }
  0xef   : > { %647 = vst [vmem:[%s1223_s5 + $0x40] sm:$0xff] %v583_v7 }
  0xf0   : > { %648 = vst [vmem:[%s1223_s5 + $0x48] sm:$0xff] %v584_v41 }
  0xf1   : > { %669 = vst [vmem:[%s1223_s5 + $0xf0] sm:$0xff] %v605_v8 }
  0xf2   : > { %670 = vst [vmem:[%s1223_s5 + $0xf8] sm:$0xff] %v606_v11 }
  0xf3   : > { %v505_v37 = vpop.permute.xlu1 %504  ;;  %v535_v12 = vpop.permute.xlu2 %534 }
  0xf4   : > { %v591_v13 = vsel %vm431_vm4, %v505_v37, 0  ;;  %v592_v14 = vsel %vm432_vm5, %v505_v37, 0  ;;  %v502_v17 = vpop.permute.xlu0 %501  ;;  %v611_v19 = vsel %vm451_vm8, %v535_v12, 0  ;;  %v612_v20 = vsel %vm452_vm9, %v535_v12, 0 }
  0xf5   : > { %655 = vst [vmem:[%s1223_s5 + $0x80] sm:$0xff] %v591_v13  ;;  %v589_v18 = vsel %vm429_vm6, %v502_v17, 0  ;;  %v590_v45 = vsel %vm430_vm7, %v502_v17, 0  ;;  %vm463_vm4 = vcmp.le.s32.totalorder %v1200_v22, %v1233_v35  ;;  %vm464_vm5 = vcmp.le.s32.totalorder %v1210_v26, %v1233_v35 }
  0xf6   : > { %656 = vst [vmem:[%s1223_s5 + $0x88] sm:$0xff] %v592_v14  ;;  %vm449_vm6 = vcmp.le.s32.totalorder %v1200_v22, %v1164_v61  ;;  %vm450_vm7 = vcmp.le.s32.totalorder %v1210_v26, %v1164_v61  ;;  %vm447_vm8 = vcmp.le.s32.totalorder %v1200_v22, %v1193_v16  ;;  %vm448_vm9 = vcmp.le.s32.totalorder %v1210_v26, %v1193_v16 }
  0xf7   : > { %653 = vst [vmem:[%s1223_s5 + $0x70] sm:$0xff] %v589_v18 }
  0xf8   : > { %654 = vst [vmem:[%s1223_s5 + $0x78] sm:$0xff] %v590_v45 }
  0xf9   : > { %675 = vst [vmem:[%s1223_s5 + $0x120] sm:$0xff] %v611_v19 }
  0xfa   : > { %676 = vst [vmem:[%s1223_s5 + $0x128] sm:$0xff] %v612_v20 }
  0xfb   : > { %v514_v62 = vpop.permute.xlu1 %513  ;;  %v544_v21 = vpop.permute.xlu2 %543 }
  0xfc   : > { %v597_v25 = vsel %vm437_vm10, %v514_v62, 0  ;;  %v598_v27 = vsel %vm438_vm11, %v514_v62, 0  ;;  %v511_v29 = vpop.permute.xlu0 %510  ;;  %v617_v32 = vsel %vm457_vm14, %v544_v21, 0  ;;  %v618_v34 = vsel %vm458_vm15, %v544_v21, 0 }
  0xfd   : > { %661 = vst [vmem:[%s1223_s5 + $0xb0] sm:$0xff] %v597_v25  ;;  %v595_v31 = vsel %vm435_vm12, %v511_v29, 0  ;;  %v596_v49 = vsel %vm436_vm13, %v511_v29, 0  ;;  %vm469_vm10 = vcmp.le.s32.totalorder %v1200_v22, %v1243_v42  ;;  %vm470_vm11 = vcmp.le.s32.totalorder %v1210_v26, %v1243_v42 }
  0xfe   : > { %662 = vst [vmem:[%s1223_s5 + $0xb8] sm:$0xff] %v598_v27  ;;  %vm455_vm12 = vcmp.le.s32.totalorder %v1200_v22, %v1173_v3  ;;  %vm456_vm13 = vcmp.le.s32.totalorder %v1210_v26, %v1173_v3  ;;  %vm453_vm14 = vcmp.le.s32.totalorder %v1200_v22, %v1204_v24  ;;  %vm454_vm15 = vcmp.le.s32.totalorder %v1210_v26, %v1204_v24 }
  0xff   : > { %659 = vst [vmem:[%s1223_s5 + $0xa0] sm:$0xff] %v595_v31 }
 0x100   : > { %660 = vst [vmem:[%s1223_s5 + $0xa8] sm:$0xff] %v596_v49 }
 0x101   : > { %681 = vst [vmem:[%s1223_s5 + $0x150] sm:$0xff] %v617_v32 }
 0x102   : > { %682 = vst [vmem:[%s1223_s5 + $0x158] sm:$0xff] %v618_v34 }
 0x103   : > { %v523_v4 = vpop.permute.xlu1 %522  ;;  %v553_v36 = vpop.permute.xlu2 %552 }
 0x104   : > { %v603_v30 = vsel %vm443_vm0, %v523_v4, 0  ;;  %v604_v38 = vsel %vm444_vm1, %v523_v4, 0  ;;  %v520_v40 = vpop.permute.xlu0 %519  ;;  %v623_v44 = vsel %vm463_vm4, %v553_v36, 0  ;;  %v624_v47 = vsel %vm464_vm5, %v553_v36, 0 }
 0x105   : > { %667 = vst [vmem:[%s1223_s5 + $0xe0] sm:$0xff] %v603_v30  ;;  %v601_v43 = vsel %vm441_vm2, %v520_v40, 0  ;;  %v602_v55 = vsel %vm442_vm3, %v520_v40, 0  ;;  %vm475_vm0 = vcmp.le.s32.totalorder %v1200_v22, %v1253_v48  ;;  %vm476_vm1 = vcmp.le.s32.totalorder %v1210_v26, %v1253_v48 }
 0x106   : > { %668 = vst [vmem:[%s1223_s5 + $0xe8] sm:$0xff] %v604_v38  ;;  %vm461_vm2 = vcmp.le.s32.totalorder %v1200_v22, %v1182_v9  ;;  %vm462_vm3 = vcmp.le.s32.totalorder %v1210_v26, %v1182_v9  ;;  %vm459_vm4 = vcmp.le.s32.totalorder %v1200_v22, %v1219_v28  ;;  %vm460_vm5 = vcmp.le.s32.totalorder %v1210_v26, %v1219_v28 }
 0x107   : > { %665 = vst [vmem:[%s1223_s5 + $0xd0] sm:$0xff] %v601_v43 }
 0x108   : > { %666 = vst [vmem:[%s1223_s5 + $0xd8] sm:$0xff] %v602_v55 }
 0x109   : > { %687 = vst [vmem:[%s1223_s5 + $0x180] sm:$0xff] %v623_v44 }
 0x10a   : > { %688 = vst [vmem:[%s1223_s5 + $0x188] sm:$0xff] %v624_v47 }
 0x10b   : > { %v532_v10 = vpop.permute.xlu1 %531  ;;  %v562_v51 = vpop.permute.xlu2 %561 }
 0x10c   : > { %v609_v35 = vsel %vm449_vm6, %v532_v10, 0  ;;  %v610_v52 = vsel %vm450_vm7, %v532_v10, 0  ;;  %v529_v53 = vpop.permute.xlu0 %528  ;;  %v629_v56 = vsel %vm469_vm10, %v562_v51, 0  ;;  %v630_v58 = vsel %vm470_vm11, %v562_v51, 0 }
 0x10d   : > { %673 = vst [vmem:[%s1223_s5 + $0x110] sm:$0xff] %v609_v35  ;;  %v607_v54 = vsel %vm447_vm8, %v529_v53, 0  ;;  %v608_v61 = vsel %vm448_vm9, %v529_v53, 0  ;;  %vm467_vm6 = vcmp.le.s32.totalorder %v1200_v22, %v1191_v15  ;;  %vm468_vm7 = vcmp.le.s32.totalorder %v1210_v26, %v1191_v15 }
 0x10e   : > { %674 = vst [vmem:[%s1223_s5 + $0x118] sm:$0xff] %v610_v52  ;;  %vm465_vm8 = vcmp.le.s32.totalorder %v1200_v22, %v1231_v33  ;;  %vm466_vm9 = vcmp.le.s32.totalorder %v1210_v26, %v1231_v33  ;;  %vm473_vm10 = vcmp.le.s32.totalorder %v1200_v22, %v1202_v23  ;;  %vm474_vm11 = vcmp.le.s32.totalorder %v1210_v26, %v1202_v23 }
 0x10f   : > { %671 = vst [vmem:[%s1223_s5 + $0x100] sm:$0xff] %v607_v54 }
 0x110   : > { %672 = vst [vmem:[%s1223_s5 + $0x108] sm:$0xff] %v608_v61 }
 0x111   : > { %693 = vst [vmem:[%s1223_s5 + $0x1b0] sm:$0xff] %v629_v56 }
 0x112   : > { %694 = vst [vmem:[%s1223_s5 + $0x1b8] sm:$0xff] %v630_v58 }
 0x113   : > { %v541_v16 = vpop.permute.xlu1 %540  ;;  %v571_v59 = vpop.permute.xlu2 %570 }
 0x114   : > { %v615_v42 = vsel %vm455_vm12, %v541_v16, 0  ;;  %v616_v60 = vsel %vm456_vm13, %v541_v16, 0  ;;  %v538_v50 = vpop.permute.xlu0 %537  ;;  %v635_v3 = vsel %vm475_vm0, %v571_v59, 0  ;;  %v636_v57 = vsel %vm476_vm1, %v571_v59, 0 }
 0x115   : > { %679 = vst [vmem:[%s1223_s5 + $0x140] sm:$0xff] %v615_v42  ;;  %v613_v63 = vsel %vm453_vm14, %v538_v50, 0  ;;  %v614_v0 = vsel %vm454_vm15, %v538_v50, 0  ;;  %vm471_vm12 = vcmp.le.s32.totalorder %v1200_v22, %v1241_v39  ;;  %vm472_vm13 = vcmp.le.s32.totalorder %v1210_v26, %v1241_v39 }
 0x116   : > { %680 = vst [vmem:[%s1223_s5 + $0x148] sm:$0xff] %v616_v60  ;;  %vm477_vm14 = vcmp.le.s32.totalorder %v1200_v22, %v1251_v46  ;;  %vm478_vm15 = vcmp.le.s32.totalorder %v1210_v26, %v1251_v46 }
 0x117   : > { %677 = vst [vmem:[%s1223_s5 + $0x130] sm:$0xff] %v613_v63 }
 0x118   : > { %678 = vst [vmem:[%s1223_s5 + $0x138] sm:$0xff] %v614_v0 }
 0x119   : > { %699 = vst [vmem:[%s1223_s5 + $0x1e0] sm:$0xff] %v635_v3 }
 0x11a   : > { %700 = vst [vmem:[%s1223_s5 + $0x1e8] sm:$0xff] %v636_v57 }
 0x11b   : > { %v550_v24 = vpop.permute.xlu1 %549 }
 0x11c   : > { %v621_v48 = vsel %vm461_vm2, %v550_v24, 0  ;;  %v622_v1 = vsel %vm462_vm3, %v550_v24, 0  ;;  %v547_v2 = vpop.permute.xlu0 %546 }
 0x11d   : > { %685 = vst [vmem:[%s1223_s5 + $0x170] sm:$0xff] %v621_v48  ;;  %v619_v5 = vsel %vm459_vm4, %v547_v2, 0  ;;  %v620_v6 = vsel %vm460_vm5, %v547_v2, 0 }
 0x11e   : > { %686 = vst [vmem:[%s1223_s5 + $0x178] sm:$0xff] %v622_v1 }
 0x11f   : > { %683 = vst [vmem:[%s1223_s5 + $0x160] sm:$0xff] %v619_v5 }
 0x120   : > { %684 = vst [vmem:[%s1223_s5 + $0x168] sm:$0xff] %v620_v6 }
 0x123   : > { %v559_v9 = vpop.permute.xlu1 %558 }
 0x124   : > { %v627_v28 = vsel %vm467_vm6, %v559_v9, 0  ;;  %v628_v7 = vsel %vm468_vm7, %v559_v9, 0  ;;  %v556_v41 = vpop.permute.xlu0 %555 }
 0x125   : > { %691 = vst [vmem:[%s1223_s5 + $0x1a0] sm:$0xff] %v627_v28  ;;  %v625_v8 = vsel %vm465_vm8, %v556_v41, 0  ;;  %v626_v11 = vsel %vm466_vm9, %v556_v41, 0 }
 0x126   : > { %692 = vst [vmem:[%s1223_s5 + $0x1a8] sm:$0xff] %v628_v7 }
 0x127   : > { %689 = vst [vmem:[%s1223_s5 + $0x190] sm:$0xff] %v625_v8 }
 0x128   : > { %690 = vst [vmem:[%s1223_s5 + $0x198] sm:$0xff] %v626_v11 }
 0x12b   : > { %v568_v15 = vpop.permute.xlu1 %567 }
 0x12c   : > { %v633_v33 = vsel %vm473_vm10, %v568_v15, 0  ;;  %v634_v37 = vsel %vm474_vm11, %v568_v15, 0  ;;  %v565_v12 = vpop.permute.xlu0 %564 }
 0x12d   : > { %697 = vst [vmem:[%s1223_s5 + $0x1d0] sm:$0xff] %v633_v33  ;;  %v631_v13 = vsel %vm471_vm12, %v565_v12, 0  ;;  %v632_v14 = vsel %vm472_vm13, %v565_v12, 0 }
 0x12e   : > { %698 = vst [vmem:[%s1223_s5 + $0x1d8] sm:$0xff] %v634_v37 }
 0x12f   : > { %695 = vst [vmem:[%s1223_s5 + $0x1c0] sm:$0xff] %v631_v13 }
 0x130   : > { %696 = vst [vmem:[%s1223_s5 + $0x1c8] sm:$0xff] %v632_v14 }
 0x134   : > { %v574_v23 = vpop.permute.xlu0 %573 }
 0x135   : > { %v637_v39 = vsel %vm477_vm14, %v574_v23, 0  ;;  %v638_v17 = vsel %vm478_vm15, %v574_v23, 0 }
 0x136   : > { %701 = vst [vmem:[%s1223_s5 + $0x1f0] sm:$0xff] %v637_v39 }
 0x137   : > { %702 = vst [vmem:[%s1223_s5 + $0x1f8] sm:$0xff] %v638_v17 }
 0x138   : > { %950 = shalt.err (!%p947_p5)
}
 0x139   : > { %s1004_s29 = smov 256   ;;  %s1005_s30 = smov 16  }
 0x13a   : > { %862 = dma.vmem_to_hbm [thread:$0]  (%p1061_p4), %s722_s15, 8192, %s724_s16, %s704_s18, %s1004_s29, %s1004_s29, %s1005_s30  }
 0x13b PF: > { %p868_p6 = scmp.ge.s32.totalorder %s1001_s14, 2  ;;  %s738_s3 = sand.u32 1, %s981_s9  }
 0x13c   : > { %s739_s4 = scalar_lea.sflag [#allocation3], %s738_s3 }
 0x13d   : > { %p865_p7 = pnand %p868_p6, %p1068_p8 }
 0x13f   : > { %p866_p9 = pneg %p865_p7 }
 0x141   : > { %976 = dma.done.wait (%p866_p9), %s739_s4, 8192  }
 0x142   : > { %978 = vsyncadd (%p866_p9), %s739_s4, 4294959104  ;;  %s15_s14 = sadd.s32 1, %s1001_s14   ;;  %s1469_s9 = smov %s985_s10 }
 0x143   : > { %p12_p10 = scmp.ge.s32.totalorder %s15_s14, 4   ;;  %s1470_s10 = smov %s989_s11 }
 0x144   : > { %s1471_s11 = smov %s1074_s22  ;;  %s1472_s12 = smov %s997_s13 }
 0x145   : > { %s1473_s13 = smov %s1475_s17  ;;  %14 = sbr.rel (!%p12_p10) target bundleno = 4 (0x4), region = 66 }
 0x14a   :  { %745 = vsyncpa [#allocation3], 1 }
 0x14b   :  { %747 = vsyncpa [#allocation3 + $0x1], 1 }

</bundles_post_ra>
